<compile_context>
chip_gen: v7x
topology: tpu7x:2x2x1
jax: 0.10.0
libtpu: 0.0.40
codegen_flags: <defaults>
</compile_context>

<pallas_src>
import jax
import jax.numpy as jnp
from jax.experimental import pallas as pl
from jax.experimental.pallas import tpu as pltpu

TILE_B_DEFAULT = 1024  # batch tile; large tiles amortize per-grid-step overhead


def _round_up(x, m):
    return (x + m - 1) // m * m


def _qnet_kernel(x_ref,
                 w1_ref, b1_ref,
                 w2_ref, b2_ref,
                 w3_ref, b3_ref,
                 wo_ref, bo_ref,
                 out_ref):
    """One batch tile: 4 fused matmuls + bias + ReLU, all in VMEM."""
    x = x_ref[...]  # float32

    h = jnp.dot(x, w1_ref[...], preferred_element_type=jnp.float32) + b1_ref[...]
    h = jnp.maximum(h, 0.0)
    h = jnp.dot(h, w2_ref[...], preferred_element_type=jnp.float32) + b2_ref[...]
    h = jnp.maximum(h, 0.0)
    h = jnp.dot(h, w3_ref[...], preferred_element_type=jnp.float32) + b3_ref[...]
    h = jnp.maximum(h, 0.0)
    out = jnp.dot(h, wo_ref[...], preferred_element_type=jnp.float32) + bo_ref[...]

    out_ref[...] = out.astype(out_ref.dtype)


@jax.jit
def qnetwork_forward(state, params):
    """state: [B, state_size] float32 -> [B, action_size] float32."""
    (w1, b1), (w2, b2), (w3, b3), (wo, bo) = params
    B, S = state.shape
    A = wo.shape[1]

    # Adaptive batch tile: multiple of 8 (sublane), capped at TILE_B_DEFAULT.
    # No wrapper-side padding/slicing: Pallas masks the ragged last block.
    tile_b = min(TILE_B_DEFAULT, _round_up(B, 8))
    grid = (pl.cdiv(B, tile_b),)

    def resident(a):
        # Full array as a single block; same block index every grid step, so it
        # stays VMEM-resident and is not re-DMA'd per batch tile.
        return pl.BlockSpec(a.shape, lambda i: (0,) * a.ndim)

    in_specs = [
        pl.BlockSpec((tile_b, S), lambda i: (i, 0)),   # streamed activation tile
        resident(w1), resident(b1),
        resident(w2), resident(b2),
        resident(w3), resident(b3),
        resident(wo), resident(bo),
    ]
    # Narrow output block: last dim == full array last dim (action_size) is
    # legal; only the useful bytes hit HBM and nothing is sliced afterwards.
    out_spec = pl.BlockSpec((tile_b, A), lambda i: (i, 0))

    return pl.pallas_call(
        _qnet_kernel,
        out_shape=jax.ShapeDtypeStruct((B, A), jnp.float32),
        grid=grid,
        in_specs=in_specs,
        out_specs=out_spec,
        compiler_params=pltpu.CompilerParams(
            dimension_semantics=("parallel",),       # batch axis; use CORE_PARALLEL on v7x if profiling shows 1 TC
            vmem_limit_bytes=32 * 1024 * 1024,       # safe on v5e/v6e/v7x; usage is << this
        ),
    )(state, w1, b1, w2, b2, w3, b3, wo, bo)


def init_qnetwork_params(key, state_size, action_size):
    """Deterministic init mimicking PyTorch nn.Linear (uniform +-1/sqrt(fan_in)).

    Weights stored as [in, out]; biases as [1, out] (broadcast over batch).
    """
    sizes = [(state_size, 32), (32, 64), (64, 128), (128, action_size)]
    params = []
    for (fan_in, fan_out) in sizes:
        key, kw, kb = jax.random.split(key, 3)
        bound = 1.0 / jnp.sqrt(float(fan_in))
        w = jax.random.uniform(kw, (fan_in, fan_out), jnp.float32, -bound, bound)
        b = jax.random.uniform(kb, (1, fan_out), jnp.float32, -bound, bound)
        params.append((w, b))
    return params


def qnetwork_reference(state, params):
    """Pure-JAX reference of the same forward pass."""
    (w1, b1), (w2, b2), (w3, b3), (wo, bo) = params
    h = jnp.maximum(state @ w1 + b1, 0.0)
    h = jnp.maximum(h @ w2 + b2, 0.0)
    h = jnp.maximum(h @ w3 + b3, 0.0)
    return h @ wo + bo


if __name__ == "__main__":
    key = jax.random.PRNGKey(0)
    state_size = 8
    action_size = 4
    batch = 2

    kparams, kstate = jax.random.split(key)
    params = init_qnetwork_params(kparams, state_size, action_size)
    state = jax.random.normal(kstate, (batch, state_size), jnp.float32)

    out = qnetwork_forward(state, params)
    out = jax.block_until_ready(out)

    ref = qnetwork_reference(state, params)
    assert out.shape == (batch, action_size)
    assert jnp.allclose(out, ref, atol=1e-5, rtol=1e-5)

    # Single-step, no padding (B multiple of 8, fits one tile).
    mid_state = jax.random.normal(jax.random.PRNGKey(1), (1000, state_size), jnp.float32)
    mid_out = jax.block_until_ready(qnetwork_forward(mid_state, params))
    assert mid_out.shape == (1000, action_size)
    assert jnp.allclose(mid_out, qnetwork_reference(mid_state, params), atol=1e-5, rtol=1e-5)

    # Multi-step grid with a ragged (masked) last block.
    big_state = jax.random.normal(jax.random.PRNGKey(2), (2500, state_size), jnp.float32)
    big_out = jax.block_until_ready(qnetwork_forward(big_state, params))
    assert big_out.shape == (2500, action_size)
    assert jnp.allclose(big_out, qnetwork_reference(big_state, params), atol=1e-5, rtol=1e-5)

    print("KERNEL_OK")
</pallas_src>

<mosaic_0001>
module attributes {stable_mosaic.version = 11 : i64} {
  func.func @_qnet_kernel(%arg0: i32, %arg1: memref<8x8xf32, #tpu.memory_space<vmem>>, %arg2: memref<8x32xf32, #tpu.memory_space<vmem>>, %arg3: memref<1x32xf32, #tpu.memory_space<vmem>>, %arg4: memref<32x64xf32, #tpu.memory_space<vmem>>, %arg5: memref<1x64xf32, #tpu.memory_space<vmem>>, %arg6: memref<64x128xf32, #tpu.memory_space<vmem>>, %arg7: memref<1x128xf32, #tpu.memory_space<vmem>>, %arg8: memref<128x4xf32, #tpu.memory_space<vmem>>, %arg9: memref<1x4xf32, #tpu.memory_space<vmem>>, %arg10: memref<8x4xf32, #tpu.memory_space<vmem>>) attributes {dimension_semantics = [#tpu.dimension_semantics<parallel>], iteration_bounds = array<i64: 1>, scalar_prefetch = 0 : i64, scratch_operands = 0 : i64, tpu.core_type = #tpu.core_type<tc>, window_params = [{transform_indices = @transform_0, window_bounds = array<i64: 8, 8>}, {pipeline_mode = #tpu.pipeline_mode<synchronous>, transform_indices = @transform_1, window_bounds = array<i64: 8, 32>}, {pipeline_mode = #tpu.pipeline_mode<synchronous>, transform_indices = @transform_2, window_bounds = array<i64: 1, 32>}, {pipeline_mode = #tpu.pipeline_mode<synchronous>, transform_indices = @transform_3, window_bounds = array<i64: 32, 64>}, {pipeline_mode = #tpu.pipeline_mode<synchronous>, transform_indices = @transform_4, window_bounds = array<i64: 1, 64>}, {pipeline_mode = #tpu.pipeline_mode<synchronous>, transform_indices = @transform_5, window_bounds = array<i64: 64, 128>}, {pipeline_mode = #tpu.pipeline_mode<synchronous>, transform_indices = @transform_6, window_bounds = array<i64: 1, 128>}, {pipeline_mode = #tpu.pipeline_mode<synchronous>, transform_indices = @transform_7, window_bounds = array<i64: 128, 4>}, {pipeline_mode = #tpu.pipeline_mode<synchronous>, transform_indices = @transform_8, window_bounds = array<i64: 1, 4>}, {transform_indices = @transform_9, window_bounds = array<i64: 8, 4>}]} {
    %c0 = arith.constant 0 : index
    %c0_0 = arith.constant 0 : index
    %0 = vector.load %arg1[%c0, %c0_0] : memref<8x8xf32, #tpu.memory_space<vmem>>, vector<8x8xf32>
    %c0_1 = arith.constant 0 : index
    %c0_2 = arith.constant 0 : index
    %1 = vector.load %arg2[%c0_1, %c0_2] : memref<8x32xf32, #tpu.memory_space<vmem>>, vector<8x32xf32>
    %cst = arith.constant dense<0.000000e+00> : vector<8x32xf32>
    %2 = tpu.matmul %0, %1, %cst {dimension_numbers = #tpu.dot_dimension_numbers<[1], [0], [0], [1], [0, 0, 1, 1], [], []>} : vector<8x8xf32>, vector<8x32xf32>, vector<8x32xf32> -> vector<8x32xf32>
    %c0_3 = arith.constant 0 : index
    %c0_4 = arith.constant 0 : index
    %3 = vector.load %arg3[%c0_3, %c0_4] : memref<1x32xf32, #tpu.memory_space<vmem>>, vector<1x32xf32>
    %4 = vector.broadcast %3 : vector<1x32xf32> to vector<8x32xf32>
    %5 = arith.addf %2, %4 : vector<8x32xf32>
    %cst_5 = arith.constant 0.000000e+00 : f32
    %6 = vector.broadcast %cst_5 : f32 to vector<8x32xf32>
    %7 = arith.maximumf %5, %6 : vector<8x32xf32>
    %c0_6 = arith.constant 0 : index
    %c0_7 = arith.constant 0 : index
    %8 = vector.load %arg4[%c0_6, %c0_7] : memref<32x64xf32, #tpu.memory_space<vmem>>, vector<32x64xf32>
    %cst_8 = arith.constant dense<0.000000e+00> : vector<8x64xf32>
    %9 = tpu.matmul %7, %8, %cst_8 {dimension_numbers = #tpu.dot_dimension_numbers<[1], [0], [0], [1], [0, 0, 1, 1], [], []>} : vector<8x32xf32>, vector<32x64xf32>, vector<8x64xf32> -> vector<8x64xf32>
    %c0_9 = arith.constant 0 : index
    %c0_10 = arith.constant 0 : index
    %10 = vector.load %arg5[%c0_9, %c0_10] : memref<1x64xf32, #tpu.memory_space<vmem>>, vector<1x64xf32>
    %11 = vector.broadcast %10 : vector<1x64xf32> to vector<8x64xf32>
    %12 = arith.addf %9, %11 : vector<8x64xf32>
    %cst_11 = arith.constant 0.000000e+00 : f32
    %13 = vector.broadcast %cst_11 : f32 to vector<8x64xf32>
    %14 = arith.maximumf %12, %13 : vector<8x64xf32>
    %c0_12 = arith.constant 0 : index
    %c0_13 = arith.constant 0 : index
    %15 = vector.load %arg6[%c0_12, %c0_13] : memref<64x128xf32, #tpu.memory_space<vmem>>, vector<64x128xf32>
    %cst_14 = arith.constant dense<0.000000e+00> : vector<8x128xf32>
    %16 = tpu.matmul %14, %15, %cst_14 {dimension_numbers = #tpu.dot_dimension_numbers<[1], [0], [0], [1], [0, 0, 1, 1], [], []>} : vector<8x64xf32>, vector<64x128xf32>, vector<8x128xf32> -> vector<8x128xf32>
    %c0_15 = arith.constant 0 : index
    %c0_16 = arith.constant 0 : index
    %17 = vector.load %arg7[%c0_15, %c0_16] : memref<1x128xf32, #tpu.memory_space<vmem>>, vector<1x128xf32>
    %18 = vector.broadcast %17 : vector<1x128xf32> to vector<8x128xf32>
    %19 = arith.addf %16, %18 : vector<8x128xf32>
    %cst_17 = arith.constant 0.000000e+00 : f32
    %20 = vector.broadcast %cst_17 : f32 to vector<8x128xf32>
    %21 = arith.maximumf %19, %20 : vector<8x128xf32>
    %c0_18 = arith.constant 0 : index
    %c0_19 = arith.constant 0 : index
    %22 = vector.load %arg8[%c0_18, %c0_19] : memref<128x4xf32, #tpu.memory_space<vmem>>, vector<128x4xf32>
    %cst_20 = arith.constant dense<0.000000e+00> : vector<8x4xf32>
    %23 = tpu.matmul %21, %22, %cst_20 {dimension_numbers = #tpu.dot_dimension_numbers<[1], [0], [0], [1], [0, 0, 1, 1], [], []>} : vector<8x128xf32>, vector<128x4xf32>, vector<8x4xf32> -> vector<8x4xf32>
    %c0_21 = arith.constant 0 : index
    %c0_22 = arith.constant 0 : index
    %24 = vector.load %arg9[%c0_21, %c0_22] : memref<1x4xf32, #tpu.memory_space<vmem>>, vector<1x4xf32>
    %25 = vector.broadcast %24 : vector<1x4xf32> to vector<8x4xf32>
    %26 = arith.addf %23, %25 : vector<8x4xf32>
    %c0_23 = arith.constant 0 : index
    %c0_24 = arith.constant 0 : index
    %27 = vector.load %arg10[%c0_23, %c0_24] : memref<8x4xf32, #tpu.memory_space<vmem>>, vector<8x4xf32>
    tpu.vector_store %arg10[%c0_23, %c0_24], %26 {strides = array<i32>} : memref<8x4xf32, #tpu.memory_space<vmem>>, vector<8x4xf32>,
    return
  }
  func.func @transform_0(%arg0: i32) -> (i32, i32) {
    %c0_i32 = arith.constant 0 : i32
    %c0_i32_0 = arith.constant 0 : i32
    return %arg0, %c0_i32 : i32, i32
  }
  func.func @transform_1(%arg0: i32) -> (i32, i32) {
    %c0_i32 = arith.constant 0 : i32
    %c0_i32_0 = arith.constant 0 : i32
    %c0_i32_1 = arith.constant 0 : i32
    return %c0_i32, %c0_i32_0 : i32, i32
  }
  func.func @transform_2(%arg0: i32) -> (i32, i32) {
    %c0_i32 = arith.constant 0 : i32
    %c0_i32_0 = arith.constant 0 : i32
    %c0_i32_1 = arith.constant 0 : i32
    return %c0_i32, %c0_i32_0 : i32, i32
  }
  func.func @transform_3(%arg0: i32) -> (i32, i32) {
    %c0_i32 = arith.constant 0 : i32
    %c0_i32_0 = arith.constant 0 : i32
    %c0_i32_1 = arith.constant 0 : i32
    return %c0_i32, %c0_i32_0 : i32, i32
  }
  func.func @transform_4(%arg0: i32) -> (i32, i32) {
    %c0_i32 = arith.constant 0 : i32
    %c0_i32_0 = arith.constant 0 : i32
    %c0_i32_1 = arith.constant 0 : i32
    return %c0_i32, %c0_i32_0 : i32, i32
  }
  func.func @transform_5(%arg0: i32) -> (i32, i32) {
    %c0_i32 = arith.constant 0 : i32
    %c0_i32_0 = arith.constant 0 : i32
    %c0_i32_1 = arith.constant 0 : i32
    return %c0_i32, %c0_i32_0 : i32, i32
  }
  func.func @transform_6(%arg0: i32) -> (i32, i32) {
    %c0_i32 = arith.constant 0 : i32
    %c0_i32_0 = arith.constant 0 : i32
    %c0_i32_1 = arith.constant 0 : i32
    return %c0_i32, %c0_i32_0 : i32, i32
  }
  func.func @transform_7(%arg0: i32) -> (i32, i32) {
    %c0_i32 = arith.constant 0 : i32
    %c0_i32_0 = arith.constant 0 : i32
    %c0_i32_1 = arith.constant 0 : i32
    return %c0_i32, %c0_i32_0 : i32, i32
  }
  func.func @transform_8(%arg0: i32) -> (i32, i32) {
    %c0_i32 = arith.constant 0 : i32
    %c0_i32_0 = arith.constant 0 : i32
    %c0_i32_1 = arith.constant 0 : i32
    return %c0_i32, %c0_i32_0 : i32, i32
  }
  func.func @transform_9(%arg0: i32) -> (i32, i32) {
    %c0_i32 = arith.constant 0 : i32
    %c0_i32_0 = arith.constant 0 : i32
    return %arg0, %c0_i32 : i32, i32
  }
}

</mosaic_0001>

<bundles_post_ra>
// kernel: qnetwork_forward.1
= control target key start
LH: loop header
LB: loop body
LE: loop exit
PB: predicated region body
PF: predicated region fallthrough
CT: control target
= control target key end

     0   :  { %14 = vsyncpa [#allocation3], 0  ;;  %v586_v2 = vmov 0.0   ;;  %vm587_vm0 = vmmov 0   ;;  %vm42_vm1 = vcmask 64512   ;;  %v588_v6 = vmov 0.0|0.0   ;;  %s774_s0 = inlined_call_operand.vmem [shape: f32[2,8], index: 0, kind: input, shape index: {}]   ;;  %s775_s1 = inlined_call_operand.vmem [shape: f32[8,32], index: 1, kind: input, shape index: {}]   ;;  %s776_s2 = inlined_call_operand.vmem [shape: f32[1,32], index: 2, kind: input, shape index: {}]   ;;  %s777_s3 = inlined_call_operand.vmem [shape: f32[32,64], index: 3, kind: input, shape index: {}]   ;;  %s778_s4 = inlined_call_operand.vmem [shape: f32[1,64], index: 4, kind: input, shape index: {}]   ;;  %s779_s5 = inlined_call_operand.vmem [shape: f32[64,128], index: 5, kind: input, shape index: {}]   ;;  %s780_s6 = inlined_call_operand.vmem [shape: f32[1,128], index: 6, kind: input, shape index: {}]   ;;  %s781_s7 = inlined_call_operand.vmem [shape: f32[128,4], index: 7, kind: input, shape index: {}]   ;;  %s782_s8 = inlined_call_operand.vmem [shape: f32[1,4], index: 8, kind: input, shape index: {}]   ;;  %s783_s9 = inlined_call_operand.hbm [shape: f32[2,4], index: 9, kind: output, shape index: {}]  }
   0x1   :  { %v34_v0 = vld [vmem:[%s775_s1] sm:$0xff]  ;;  %444 = vmatprep.subr.mxu0 %v586_v2  ;;  %446 = vmatprep.mubr.msk.f32.mxu0 %vm587_vm0, %v586_v2  ;;  %v118_v4 = vld [vmem:[%s777_s3 + $0x8] sm:$0xff]  ;;  %v119_v7 = vld [vmem:[%s777_s3 + $0x10] sm:$0xff]  ;;  %vm128_vm2 = vcmask 261120   ;;  %vm218_vm3 = vcmask 523264   ;;  %vm386_vm4 = vcmask 31744  }
   0x2   :  { %v33_v1 = vld [vmem:[%s774_s0] sm:$0xff]  ;;  %445 = vmatpush3.msra.mxu0 %v34_v0  ;;  %532 = vmatprep.subr.bf16.mxu1 %v588_v6  ;;  %v120_v8 = vld [vmem:[%s777_s3 + $0x18] sm:$0xff]  ;;  %v204_v12 = vld [vmem:[%s779_s5 + $0x8] sm:$0xff] }
   0x3   :  { %v117_v3 = vld [vmem:[%s777_s3] sm:$0xff]  ;;  %447 = vmatmul.mubr.msk.f32.vlgmr.msra.gmra.mrb[0].mxu0 %vm42_vm1, %v33_v1  ;;  %514 = vmatprep.subr.bf16.mxu0 %v588_v6  ;;  %v518_v9 = vpack.c.bf16 %v120_v8, %v119_v7  ;;  %v205_v18 = vld [vmem:[%s779_s5 + $0x10] sm:$0xff]  ;;  %v206_v19 = vld [vmem:[%s779_s5 + $0x18] sm:$0xff] }
   0x4   :  { %v515_v5 = vpack.c.bf16 %v118_v4, %v117_v3  ;;  %457 = vmatprep.mubr.msk.f32.mxu0 %vm587_vm0, %v586_v2  ;;  %511 = vmatprep.mubr.msk.f32.mxu1 %vm587_vm0, %v586_v2  ;;  %v404_v10 = vld [vmem:[%s776_s2] ss:$0 sm:$0xff]  ;;  %v524_v20 = vpack.c.bf16 %v206_v19, %v205_v18  ;;  %v208_v22 = vld [vmem:[%s779_s5 + $0x28] sm:$0xff]  ;;  %v209_v24 = vld [vmem:[%s779_s5 + $0x30] sm:$0xff] }
   0x5   :  { %v203_v11 = vld [vmem:[%s779_s5] sm:$0xff]  ;;  %v210_v25 = vld [vmem:[%s779_s5 + $0x38] sm:$0xff]  ;;  %v294_v28 = vld [vmem:[%s781_s7 + $0x8] sm:$0xff] }
   0x6   :  { %516 = vmatpush3.bf16.msra.mxu0 %v515_v5  ;;  %v521_v16 = vpack.c.bf16 %v204_v12, %v203_v11  ;;  %v207_v21 = vld [vmem:[%s779_s5 + $0x20] sm:$0xff]  ;;  %v530_v26 = vpack.c.bf16 %v210_v25, %v209_v24  ;;  %v295_v29 = vld [vmem:[%s781_s7 + $0x10] sm:$0xff]  ;;  %v296_v31 = vld [vmem:[%s781_s7 + $0x18] sm:$0xff] }
   0x7   :  { %517 = vmatprep.subr.bf16.mxu0 %v588_v6  ;;  %v527_v23 = vpack.c.bf16 %v208_v22, %v207_v21  ;;  %v293_v27 = vld [vmem:[%s781_s7] sm:$0xff]  ;;  %v536_v32 = vpack.c.bf16 %v296_v31, %v295_v29  ;;  %v298_v34 = vld [vmem:[%s781_s7 + $0x28] sm:$0xff]  ;;  %v299_v36 = vld [vmem:[%s781_s7 + $0x30] sm:$0xff] }
   0x8   :  { %v533_v30 = vpack.c.bf16 %v294_v28, %v293_v27  ;;  %v297_v33 = vld [vmem:[%s781_s7 + $0x20] sm:$0xff]  ;;  %v300_v37 = vld [vmem:[%s781_s7 + $0x38] sm:$0xff]  ;;  %v302_v40 = vld [vmem:[%s781_s7 + $0x48] sm:$0xff] }
   0x9   :  { %v539_v35 = vpack.c.bf16 %v298_v34, %v297_v33  ;;  %v542_v38 = vpack.c.bf16 %v300_v37, %v299_v36  ;;  %v301_v39 = vld [vmem:[%s781_s7 + $0x40] sm:$0xff]  ;;  %v303_v42 = vld [vmem:[%s781_s7 + $0x50] sm:$0xff]  ;;  %v304_v43 = vld [vmem:[%s781_s7 + $0x58] sm:$0xff] }
   0xa   :  { %519 = vmatpush3.bf16.msra.mxu0 %v518_v9  ;;  %534 = vmatpush3.bf16.msra.mxu1 %v533_v30  ;;  %v545_v41 = vpack.c.bf16 %v302_v40, %v301_v39  ;;  %v548_v44 = vpack.c.bf16 %v304_v43, %v303_v42  ;;  %v305_v45 = vld [vmem:[%s781_s7 + $0x60] sm:$0xff]  ;;  %v306_v46 = vld [vmem:[%s781_s7 + $0x68] sm:$0xff]  ;;  %v307_v53 = vld [vmem:[%s781_s7 + $0x70] sm:$0xff] }
   0xb   :  { %520 = vmatprep.subr.bf16.mxu0 %v588_v6  ;;  %535 = vmatprep.subr.bf16.mxu1 %v588_v6  ;;  %v551_v47 = vpack.c.bf16 %v306_v46, %v305_v45  ;;  %v406_v48 = vld [vmem:[%s778_s4] ss:$0 sm:$0xff]  ;;  %v308_v54 = vld [vmem:[%s781_s7 + $0x78] sm:$0xff] }
   0xc   :  { %v554_v55 = vpack.c.bf16 %v308_v54, %v307_v53  ;;  %v408_v56 = vld [vmem:[%s780_s6] ss:$0 sm:$0xff] }
   0xd   :  { %v410_v61 = vld [vmem:[%s782_s8] ss:$0 sm:$0xff] }
   0xe   :  { %537 = vmatpush3.bf16.msra.mxu1 %v536_v32 }
   0xf   :  { %538 = vmatprep.subr.bf16.mxu1 %v588_v6 }
  0x12   :  { %540 = vmatpush3.bf16.msra.mxu1 %v539_v35 }
  0x13   :  { %541 = vmatprep.subr.bf16.mxu1 %v588_v6 }
  0x16   :  { %543 = vmatpush3.bf16.msra.mxu1 %v542_v38 }
  0x17   :  { %544 = vmatprep.subr.bf16.mxu1 %v588_v6 }
  0x1a   :  { %546 = vmatpush3.bf16.msra.mxu1 %v545_v41 }
  0x1b   :  { %547 = vmatprep.subr.bf16.mxu1 %v588_v6 }
  0x1e   :  { %549 = vmatpush3.bf16.msra.mxu1 %v548_v44 }
  0x1f   :  { %550 = vmatprep.subr.bf16.mxu1 %v588_v6 }
  0x22   :  { %552 = vmatpush3.bf16.msra.mxu1 %v551_v47 }
  0x23   :  { %553 = vmatprep.subr.bf16.mxu1 %v588_v6 }
  0x26   :  { %555 = vmatpush3.bf16.msra.mxu1 %v554_v55 }
  0xd6   :  { %v112_v13 = vpop.f32.mrb[0].mxu0 }
  0xd7   :  { %v113_v14 = vadd.f32 %v404_v10, %v112_v13  ;;  %v448_v15 = vpop.f32.mrb[1].mxu0 }
  0xd9   :  { %v116_v17 = vmax.f32 %v113_v14, 0.0 }
  0xdb   :  { %458 = vmatmul.mubr.msk.f32.vlgmr.msra.gmra.mrb[2].mxu0 %vm128_vm2, %v116_v17 }
  0xdc   :  { %522 = vmatpush3.bf16.msra.mxu0 %v521_v16  ;;  %476 = vmatprep.mubr.msk.f32.mxu0 %vm587_vm0, %v586_v2 }
  0xdd   :  { %523 = vmatprep.subr.bf16.mxu0 %v588_v6 }
  0xe0   :  { %525 = vmatpush3.bf16.msra.mxu0 %v524_v20 }
  0xe1   :  { %526 = vmatprep.subr.bf16.mxu0 %v588_v6 }
  0xe4   :  { %528 = vmatpush3.bf16.msra.mxu0 %v527_v23 }
  0xe5   :  { %529 = vmatprep.subr.bf16.mxu0 %v588_v6 }
  0xe8   :  { %531 = vmatpush3.bf16.msra.mxu0 %v530_v26 }
 0x1ae   :  { %v198_v49 = vpop.f32.mrb[2].mxu0 }
 0x1af   :  { %v199_v50 = vadd.f32 %v406_v48, %v198_v49  ;;  %v459_v51 = vpop.f32.mrb[3].mxu0 }
 0x1b1   :  { %v202_v52 = vmax.f32 %v199_v50, 0.0 }
 0x1b3   :  { %477 = vmatmul.mubr.msk.f32.vlgmr.msra.gmra.mrb[4].mxu0 %vm218_vm3, %v202_v52 }
 0x286   :  { %v288_v57 = vpop.f32.mrb[4].mxu0 }
 0x287   :  { %v289_v58 = vadd.f32 %v408_v56, %v288_v57  ;;  %v478_v59 = vpop.f32.mrb[5].mxu0 }
 0x289   :  { %v292_v60 = vmax.f32 %v289_v58, 0.0 }
 0x28b   :  { %512 = vmatmul.mubr.f32.vlgmr.msra.gmra.mrb[0].mxu1 %v292_v60 }
 0x35e   :  { %v382_v62 = vpop.f32.mrb[0].mxu1 }
 0x35f   :  { %v383_v63 = vadd.f32 %v410_v61, %v382_v62  ;;  %v513_v0 = vpop.f32.mrb[1].mxu1 }
 0x361   :  { %387 = vst.msk [vmem:[#allocation2] sm:$0xff] %vm386_vm4, %v383_v63 }
 0x362   :  { %392 = vsyncadd [#allocation3], 96  ;;  %s589_s7 = smov [#allocation2]  }
 0x363   :  { %s393_s22 = sshll.u32 %s589_s7, 4  ;;  %s394_s22 = int_to_ptr.vmem [resolvable:$true] %s393_s22 }
 0x364   :  { %s562_s23 = scalar_lea.vmem %s394_s22, 32  ;;  %s566_s6 = scalar_lea.vmem %s394_s22, 128 }
 0x365   :  { %p563_p0 = scmp.ne.s32.totalorder %s394_s22, %s562_s23  ;;  %p567_p1 = scmp.lt.s32.totalorder %s394_s22, %s394_s22 }
 0x366   :  { %p568_p2 = scmp.lt.s32.totalorder %s566_s6, %s562_s23 }
 0x368   :  { %p569_p3 = por %p568_p2, %p567_p1 }
 0x36a   :  { %p570_p4 = pnand %p569_p3, %p563_p0 }
 0x36c   :  { %573 = shalt.err (!%p570_p4)
}
 0x36d   :  { %s574_s8 = scalar_lea.hbm %s783_s9, 32 }
 0x36e   :  { %p575_p5 = scmp.ne.s32.totalorder %s783_s9, %s574_s8  ;;  %p578_p6 = scmp.lt.u32.totalorder %s574_s8, %s783_s9 }
 0x370   :  { %p580_p7 = pnand %p578_p6, %p575_p5 }
 0x372   :  { %583 = shalt.err (!%p580_p7)
}
 0x373   :  { %s590_s28 = smov 32   ;;  %s591_s29 = smov 2  }
 0x374   :  { %399 = dma.vmem_to_hbm [thread:$0]  %s394_s22, 32, %s783_s9, [#allocation3], %s590_s28, %s590_s28, %s591_s29  }
 0x375   :  { %584 = dma.done.wait [#allocation3], 128  }
 0x376   :  { %585 = vsyncadd [#allocation3], 4294967168 }
 0x377   :  { %403 = vsyncpa [#allocation3], 1 }

</bundles_post_ra>
